<compile_context>
chip_gen: v6e
topology: v6e:2x2x1
jax: 0.10.0
libtpu: 0.0.40
codegen_flags: <defaults>
</compile_context>

<pallas_src>
import functools

import jax
import jax.numpy as jnp
import numpy as np
from jax.experimental import pallas as pl
from jax.experimental.pallas import tpu as pltpu

LANE = 128
VMEM_LIMIT_BYTES = 48 * 1024 * 1024  # < 64 MiB (v7x physical), < 128 MiB (v5e/v6e)


def _round_up(x, m):
    return (x + m - 1) // m * m


# ---------------------------------------------------------------------------
# Kernel 1: feature projection  h = x @ W.
# ---------------------------------------------------------------------------
def proj_kernel(x_ref, w_ref, o_ref):
    x = x_ref[...].astype(jnp.bfloat16)
    w = w_ref[...].astype(jnp.bfloat16)
    h = jnp.dot(x, w, preferred_element_type=jnp.float32)
    o_ref[...] = h.astype(o_ref.dtype)


# ---------------------------------------------------------------------------
# Kernel 2: per-head attention + aggregation for one destination-row tile.
#   adj_ref : [TM, N]    int8, adj[i, j] = 1 iff edge j -> i (incl. self loops)
#   h_ref   : [N, Dh]    bf16, projected features of ALL nodes (VMEM resident)
#   a_ref   : [Dh, 2H]   f32 block matrix so  h @ a = [e_src | e_dst]
#   bias_ref: [1, Dout]  f32
#   o_ref   : [TM, Dout] f32
#   acc_ref : [TM, Dout] f32 VMEM scratch (per-head column writes -> one store)
# ---------------------------------------------------------------------------
def attn_kernel(adj_ref, h_ref, a_ref, bias_ref, o_ref, acc_ref, *,
                heads, out_feat, concat, apply_elu, tm):
    row0 = pl.multiple_of(pl.program_id(0) * tm, tm)

    h_all = h_ref[...]                                    # [N, Dh] bf16 (resident)
    a_cat = a_ref[...].astype(jnp.bfloat16)               # [Dh, 2H]

    # Fused attention-coefficient matmul: one MXU pass gives [e_src | e_dst].
    e_all = jnp.dot(h_all, a_cat, preferred_element_type=jnp.float32)   # [N, 2H]
    e_src_t = e_all[:, :heads].T                                        # [H, N]

    h_tile = h_ref[pl.ds(row0, tm), :]                                  # [TM, Dh]
    e_dst = jnp.dot(h_tile, a_cat,
                    preferred_element_type=jnp.float32)[:, heads:]      # [TM, H]

    adj_f = adj_ref[...].astype(jnp.float32)                            # [TM, N] 0/1

    if concat and heads * out_feat < acc_ref.shape[1]:
        acc_ref[...] = jnp.zeros_like(acc_ref)

    for hh in range(heads):                      # static loop, heads is small
        # score[i, j] = LeakyReLU(e_dst[i] + e_src[j]) for edge j -> i
        s = e_dst[:, hh:hh + 1] + e_src_t[hh:hh + 1, :]                 # [TM, N]
        s = jnp.where(s > 0, s, 0.2 * s)                                # LeakyReLU(0.2)
        m = jnp.max(s, axis=1, keepdims=True)    # unmasked max: still a safe bound
        p = jnp.exp(s - m) * adj_f               # mask folded in as a multiply
        denom = jnp.maximum(jnp.sum(p, axis=1, keepdims=True), 1e-30)
        alpha = (p * pl.reciprocal(denom, approx=True)).astype(jnp.bfloat16)

        if concat:
            hv = h_all[:, hh * out_feat:(hh + 1) * out_feat]            # [N, F] bf16
            acc_ref[:, hh * out_feat:(hh + 1) * out_feat] = jnp.dot(
                alpha, hv, preferred_element_type=jnp.float32)
        else:
            # concat=False: the module only uses heads == 1 here, so the head-mean
            # is the identity; aggregate against the full zero-padded h so the MXU
            # pass and the store stay 128-lane dense.
            # TODO(synk): generic multi-head mean (heads>1, concat=False) would need
            #             per-head F-slices summed across heads.
            acc_ref[...] = jnp.dot(alpha, h_all,
                                   preferred_element_type=jnp.float32)

    out = acc_ref[...] + bias_ref[...]
    if apply_elu:
        # inf-safe ELU: clamp the dead branch so exp never overflows.
        out = jnp.where(out > 0, out, jnp.exp(jnp.minimum(out, 0.0)) - 1.0)
    o_ref[...] = out


# ---------------------------------------------------------------------------
# Wrapper: one GATConv layer = projection call + attention call.
# ---------------------------------------------------------------------------
def gat_layer(x, w, a_cat, adj_i8, bias, *, heads, out_feat, concat,
              apply_elu, tm):
    n_pad, din = x.shape
    dh_pad = w.shape[1]
    dout_pad = bias.shape[1]
    assert n_pad % tm == 0 and tm % 32 == 0      # int8 adj tile: sublanes % 32
    assert concat or heads == 1
    grid = (n_pad // tm,)
    cparams = pltpu.CompilerParams(dimension_semantics=("parallel",),
                                   vmem_limit_bytes=VMEM_LIMIT_BYTES)

    h = pl.pallas_call(
        proj_kernel,
        grid=grid,
        in_specs=[pl.BlockSpec((tm, din), lambda i: (i, 0)),
                  pl.BlockSpec((din, dh_pad), lambda i: (0, 0))],
        out_specs=pl.BlockSpec((tm, dh_pad), lambda i: (i, 0)),
        out_shape=jax.ShapeDtypeStruct((n_pad, dh_pad), jnp.bfloat16),
        compiler_params=cparams,
    )(x, w)

    kernel = functools.partial(attn_kernel, heads=heads, out_feat=out_feat,
                               concat=concat, apply_elu=apply_elu, tm=tm)
    out = pl.pallas_call(
        kernel,
        grid=grid,
        in_specs=[pl.BlockSpec((tm, n_pad), lambda i: (i, 0)),           # adj (int8)
                  pl.BlockSpec((n_pad, dh_pad), lambda i: (0, 0)),       # h resident
                  pl.BlockSpec((dh_pad, 2 * heads), lambda i: (0, 0)),   # a_cat
                  pl.BlockSpec((1, dout_pad), lambda i: (0, 0))],        # bias
        out_specs=pl.BlockSpec((tm, dout_pad), lambda i: (i, 0)),
        out_shape=jax.ShapeDtypeStruct((n_pad, dout_pad), jnp.float32),
        scratch_shapes=[pltpu.VMEM((tm, dout_pad), jnp.float32)],
        compiler_params=cparams,
    )(adj_i8, h, a_cat, bias)
    # TODO(synk): for very large N, add an online-softmax (flash-style) loop over
    #             source-column tiles instead of holding full [TM, N] score rows.
    return out


def gat_forward(params, x, adj_i8, *, tm):
    p = params
    h1 = gat_layer(x, p["w1"], p["acat1"], adj_i8, p["b1"],
                   heads=p["heads1"], out_feat=p["f1"], concat=True,
                   apply_elu=True, tm=tm)        # conv1 + F.elu fused
    out = gat_layer(h1, p["w2"], p["acat2"], adj_i8, p["b2"],
                    heads=p["heads2"], out_feat=p["f2"], concat=False,
                    apply_elu=False, tm=tm)      # conv2 (heads=1, concat=False)
    return out


# ---------------------------------------------------------------------------
# Parameter / adjacency construction helpers (host-side glue).
# ---------------------------------------------------------------------------
def attn_cat_matrix(a_src, a_dst, dh_pad):
    """Per-head [H, F] src/dst vectors -> [dh_pad, 2H] block matrix so that
    h @ M = [e_src | e_dst] in a single MXU pass."""
    h, f = a_src.shape
    m = np.zeros((dh_pad, 2 * h), np.float32)
    a_src = np.asarray(a_src, np.float32)
    a_dst = np.asarray(a_dst, np.float32)
    for hh in range(h):
        m[hh * f:(hh + 1) * f, hh] = a_src[hh]
        m[hh * f:(hh + 1) * f, h + hh] = a_dst[hh]
    return jnp.asarray(m)


def pad_2d(a, rows, cols):
    out = np.zeros((rows, cols), np.float32)
    a = np.asarray(a, np.float32)
    out[:a.shape[0], :a.shape[1]] = a
    return jnp.asarray(out)


def build_adjacency_int8(edge_index, num_nodes):
    """adj[i, j] = 1 iff edge j -> i (edge_index[0]=src, [1]=dst) or i == j."""
    src = np.asarray(edge_index[0])
    dst = np.asarray(edge_index[1])
    adj = np.zeros((num_nodes, num_nodes), np.int8)
    adj[dst, src] = 1
    adj[np.arange(num_nodes), np.arange(num_nodes)] = 1   # self-loops
    return jnp.asarray(adj)


# ---------------------------------------------------------------------------
# Pure-JAX f32 reference (same math) used as a correctness check.
# ---------------------------------------------------------------------------
def gat_layer_ref(x, w, a_src, a_dst, adj, bias, heads, f, concat, apply_elu):
    n = x.shape[0]
    h = (x @ w).reshape(n, heads, f)
    e_src = (h * a_src[None]).sum(-1)
    e_dst = (h * a_dst[None]).sum(-1)
    s = e_dst[:, None, :] + e_src[None, :, :]
    s = jnp.where(s > 0, s, 0.2 * s)
    s = jnp.where(adj[:, :, None] > 0, s, -1e30)
    alpha = jax.nn.softmax(s, axis=1)
    out = jnp.einsum("ijh,jhf->ihf", alpha, h)
    out = out.reshape(n, heads * f) if concat else out.mean(1)
    out = out + bias
    if apply_elu:
        out = jnp.where(out > 0, out, jnp.exp(out) - 1.0)
    return out


if __name__ == "__main__":
    N = 64            # nodes
    INPUT_DIM = 16
    HIDDEN_DIM = 32
    OUTPUT_DIM = 8
    HEADS = 4
    TM = 32           # destination-row tile (grid = (N/TM,) = (2,))

    n_pad = _round_up(N, TM)
    dh1 = HEADS * HIDDEN_DIM                  # 128
    dh1_pad = _round_up(dh1, LANE)            # 128
    dout1_pad = dh1_pad                       # concat=True output width
    dh2_pad = _round_up(OUTPUT_DIM, LANE)     # 8 -> 128 (lane-dense padding)
    dout2_pad = dh2_pad

    key = jax.random.PRNGKey(0)
    k = jax.random.split(key, 8)

    # Layer 1: GATConv(INPUT_DIM, HIDDEN_DIM, heads=HEADS, concat=True)
    w1 = jax.random.normal(k[0], (INPUT_DIM, dh1), jnp.float32) * 0.1
    a_src1 = jax.random.normal(k[1], (HEADS, HIDDEN_DIM), jnp.float32) * 0.1
    a_dst1 = jax.random.normal(k[2], (HEADS, HIDDEN_DIM), jnp.float32) * 0.1
    b1 = jax.random.normal(k[3], (dh1,), jnp.float32) * 0.1

    # Layer 2: GATConv(HIDDEN_DIM*HEADS, OUTPUT_DIM, heads=1, concat=False)
    w2 = jax.random.normal(k[4], (dh1, OUTPUT_DIM), jnp.float32) * 0.1
    a_src2 = jax.random.normal(k[5], (1, OUTPUT_DIM), jnp.float32) * 0.1
    a_dst2 = jax.random.normal(k[6], (1, OUTPUT_DIM), jnp.float32) * 0.1
    b2 = jax.random.normal(k[7], (OUTPUT_DIM,), jnp.float32) * 0.1

    params = dict(
        w1=pad_2d(w1, INPUT_DIM, dh1_pad),
        acat1=attn_cat_matrix(a_src1, a_dst1, dh1_pad),
        b1=pad_2d(b1.reshape(1, -1), 1, dout1_pad),
        heads1=HEADS, f1=HIDDEN_DIM,
        w2=pad_2d(w2, dh1_pad, dh2_pad),
        acat2=attn_cat_matrix(a_src2, a_dst2, dh2_pad),
        b2=pad_2d(b2.reshape(1, -1), 1, dout2_pad),
        heads2=1, f2=OUTPUT_DIM,
    )

    # Node features (padded rows zero) and a deterministic edge set
    # (bidirectional ring + chords).
    x = jax.random.normal(jax.random.PRNGKey(42), (N, INPUT_DIM), jnp.float32)
    x_pad = jnp.zeros((n_pad, INPUT_DIM), jnp.float32).at[:N].set(x)

    ar = np.arange(N)
    src = np.concatenate([ar, (ar + 1) % N, ar])
    dst = np.concatenate([(ar + 1) % N, ar, (ar + 5) % N])
    edge_index = np.stack([src, dst]).astype(np.int32)       # [2, E]
    adj_i8 = build_adjacency_int8(edge_index, n_pad)

    out_pad = gat_forward(params, x_pad, adj_i8, tm=TM)
    out_pad = jax.block_until_ready(out_pad)
    out = np.asarray(out_pad)[:N, :OUTPUT_DIM]

    # Correctness check against the pure-JAX f32 reference (bf16 MXU operands and
    # the approx reciprocal loosen accuracy vs the original 1e-4 tolerance).
    adj_f32 = jnp.asarray(np.asarray(adj_i8)[:N, :N], jnp.float32)
    h1_ref = gat_layer_ref(x, w1, a_src1, a_dst1, adj_f32, b1,
                           HEADS, HIDDEN_DIM, True, True)
    out_ref = gat_layer_ref(h1_ref, w2, a_src2, a_dst2, adj_f32, b2,
                            1, OUTPUT_DIM, False, False)
    np.testing.assert_allclose(out, np.asarray(out_ref), rtol=3e-2, atol=3e-2)

    assert out.shape == (N, OUTPUT_DIM)
    print("KERNEL_OK")
</pallas_src>

<mosaic_0001>
module attributes {stable_mosaic.version = 11 : i64} {
  func.func @proj_kernel(%arg0: i32, %arg1: memref<32x16xf32, #tpu.memory_space<vmem>>, %arg2: memref<16x128xf32, #tpu.memory_space<vmem>>, %arg3: memref<32x128xbf16, #tpu.memory_space<vmem>>) attributes {dimension_semantics = [#tpu.dimension_semantics<parallel>], iteration_bounds = array<i64: 2>, scalar_prefetch = 0 : i64, scratch_operands = 0 : i64, tpu.core_type = #tpu.core_type<tc>, window_params = [{transform_indices = @transform_0, window_bounds = array<i64: 32, 16>}, {pipeline_mode = #tpu.pipeline_mode<synchronous>, transform_indices = @transform_1, window_bounds = array<i64: 16, 128>}, {transform_indices = @transform_2, window_bounds = array<i64: 32, 128>}]} {
    %c0 = arith.constant 0 : index
    %c0_0 = arith.constant 0 : index
    %0 = vector.load %arg1[%c0, %c0_0] : memref<32x16xf32, #tpu.memory_space<vmem>>, vector<32x16xf32>
    %1 = arith.truncf %0 : vector<32x16xf32> to vector<32x16xbf16>
    %c0_1 = arith.constant 0 : index
    %c0_2 = arith.constant 0 : index
    %2 = vector.load %arg2[%c0_1, %c0_2] : memref<16x128xf32, #tpu.memory_space<vmem>>, vector<16x128xf32>
    %3 = arith.truncf %2 : vector<16x128xf32> to vector<16x128xbf16>
    %cst = arith.constant dense<0.000000e+00> : vector<32x128xf32>
    %4 = tpu.matmul %1, %3, %cst {dimension_numbers = #tpu.dot_dimension_numbers<[1], [0], [0], [1], [0, 0, 1, 1], [], []>} : vector<32x16xbf16>, vector<16x128xbf16>, vector<32x128xf32> -> vector<32x128xf32>
    %5 = arith.truncf %4 : vector<32x128xf32> to vector<32x128xbf16>
    %c0_3 = arith.constant 0 : index
    %c0_4 = arith.constant 0 : index
    %6 = vector.load %arg3[%c0_3, %c0_4] : memref<32x128xbf16, #tpu.memory_space<vmem>>, vector<32x128xbf16>
    tpu.vector_store %arg3[%c0_3, %c0_4], %5 {strides = array<i32>} : memref<32x128xbf16, #tpu.memory_space<vmem>>, vector<32x128xbf16>,
    return
  }
  func.func @transform_0(%arg0: i32) -> (i32, i32) {
    %c0_i32 = arith.constant 0 : i32
    %c0_i32_0 = arith.constant 0 : i32
    return %arg0, %c0_i32 : i32, i32
  }
  func.func @transform_1(%arg0: i32) -> (i32, i32) {
    %c0_i32 = arith.constant 0 : i32
    %c0_i32_0 = arith.constant 0 : i32
    %c0_i32_1 = arith.constant 0 : i32
    return %c0_i32, %c0_i32_0 : i32, i32
  }
  func.func @transform_2(%arg0: i32) -> (i32, i32) {
    %c0_i32 = arith.constant 0 : i32
    %c0_i32_0 = arith.constant 0 : i32
    return %arg0, %c0_i32 : i32, i32
  }
}

</mosaic_0001>

<bundles_post_ra>
// kernel: tpu_custom_call.1
= control target key start
LH: loop header
LB: loop body
LE: loop exit
PB: predicated region body
PF: predicated region fallthrough
CT: control target
= control target key end

     0   :  { %7 = vsyncpa [#allocation3], 0  ;;  %s578_s0 = inlined_call_operand.vmem [shape: f32[64,16], index: 0, kind: input, shape index: {}]   ;;  %s579_s1 = inlined_call_operand.vmem [shape: f32[16,128], index: 1, kind: input, shape index: {}]   ;;  %s580_s2 = inlined_call_operand.hbm [shape: bf16[64,128], index: 2, kind: output, shape index: {}]  }
   0x1   :  { %9 = vsyncpa [#allocation3 + $0x1], 0  ;;  %s471_s9 = smov 0   ;;  %s473_s10 = smov 0  }
   0x2   :  { %s475_s11 = smov 0   ;;  %s477_s12 = smov 0  }
   0x3 LB: > { %s492_s13 = sadd.s32 4294967295, %s451_s12   ;;  %s307_s14 = sadd.s32 4294967294, %s451_s12   ;;  %s451_s12 = sphi %s477_s12, %s586_s12   ;;  %s447_s11 = sphi %s475_s11, %s585_s11   ;;  %s443_s10 = sphi %s473_s10, %s584_s10   ;;  %s439_s9 = sphi %s471_s9, %s583_s9  }
   0x4   : > { %s496_s15 = sadd.s32 1, %s451_s12   ;;  %s69_s16 = sadd.s32 1, %s447_s11 }
   0x5   : > { %s66_s17 = ssub.s32 %s451_s12, %s496_s15  ;;  %p79_p0 = scmp.ne.s32.totalorder %s447_s11, %s443_s10 }
   0x6   : > { %p67_p1 = scmp.eq.s32.totalorder %s66_s17, 0  ;;  %p80_p2 = scmp.eq.s32.totalorder %s492_s13, 1 }
   0x7   : > { %p85_p3 = scmp.ne.s32.totalorder %s443_s10, %s439_s9  ;;  %p86_p4 = scmp.eq.s32.totalorder %s307_s14, 1 }
   0x8   : > { %s507_s18 = scalar_select %p67_p1, %s447_s11, %s69_s16  }
   0x9   : > { %p509_p5 = por %p80_p2, %p79_p0  ;;  %p513_p6 = por %p86_p4, %p85_p3 }
   0xa   : > { %p310_p7 = scmp.ge.s32.totalorder %s451_s12, 1  ;;  %p116_p8 = scmp.lt.s32.totalorder %s451_s12, 3 }
   0xc   : > { %p117_p9 = pnand %p310_p7, %p116_p8 }
   0xd   : > { %s312_s25 = sshll.u32 (!%p117_p9), %s492_s13, 2  ;;  %s135_s30 = sand.u32 (!%p117_p9), 1, %s443_s10  }
   0xe   : > { %120 = sbr.rel (%p117_p9) target bundleno = 241 (0xf1), region = 28  ;;  %p139_p10 = scmp.lt.s32.totalorder (!%p117_p9), %s312_s25, 7 }
   0xf   : > { %s311_s3 = sshll.u32 (!%p117_p9), %s135_s30, 4  ;;  %s329_s6 = sshll.u32 (!%p117_p9), %s492_s13, 8 }
  0x10   : > { %s137_s4 = scalar_lea.vmem (!%p117_p9), [#allocation2], %s311_s3  ;;  %s536_s14 = scalar_lea.hbm (!%p117_p9), %s580_s2, %s329_s6 }
  0x11   : > { %s245_s5 = sshll.u32 (!%p117_p9), %s137_s4, 4  ;;  %s538_s16 = scalar_lea.sflag (!%p117_p9), [#allocation3], %s135_s30  ;;  %s531_s5 = int_to_ptr.vmem [resolvable:$true] %s245_s5 }
  0x12   : > { %s391_s17 = scalar_lea.vmem (!%p117_p9), %s531_s5, 256  ;;  %s453_s13 = smov (!%p117_p9), [#allocation2]  }
  0x13   : > { %v152_v0 = vld [vmem:[%s579_s1] sm:$0xff]  ;;  %v153_v1 = vld [vmem:[%s579_s1 + $0x8] sm:$0xff]  ;;  %s588_s25 = smov (!%p139_p10, %s312_s25), 7  ;;  %vm155_vm0 = vcmask 130048   ;;  %p392_p11 = scmp.ne.s32.totalorder %s531_s5, %s391_s17 }
  0x14   : > { %v154_v2 = vpack.c.bf16 %v153_v1, %v152_v0  ;;  %s313_s26 = sshll.u32 %s588_s25, 3  ;;  %s395_s21 = sshll.u32 %s453_s13, 4  ;;  %s396_s21 = int_to_ptr.vmem [resolvable:$false] %s395_s21 }
  0x15   : > { %s142_s29 = scalar_lea.vmem %s578_s0, %s313_s26  ;;  %p393_p12 = pnand %p392_p11, %p509_p5 }
  0x16   : > { %344 = vmatprep.subr.bf16.mxu0 %v154_v2  ;;  %v146_v3 = vld [vmem:[%s142_s29] sm:$0xff]  ;;  %v147_v4 = vld [vmem:[%s142_s29 + $0x8] sm:$0xff]  ;;  %v148_v5 = vld [vmem:[%s142_s29 + $0x10] sm:$0xff]  ;;  %s397_s22 = scalar_lea.vmem %s396_s21, 512  ;;  %p398_p0 = scmp.lt.s32.totalorder %s531_s5, %s396_s21 }
  0x17   : > { %345 = vmatpush3.bf16.msra.mxu0 %v154_v2  ;;  %v150_v6 = vpack.c.bf16 %v147_v4, %v146_v3  ;;  %v149_v7 = vld [vmem:[%s142_s29 + $0x18] sm:$0xff]  ;;  %p394_p13 = pneg %p393_p12  ;;  %p399_p1 = scmp.lt.s32.totalorder %s397_s22, %s391_s17 }
  0x18   : > { %v151_v8 = vpack.c.bf16 %v149_v7, %v148_v5 }
  0x19   : > { %346 = vmatprep.mubr.msk.bf16.mxu0 %vm155_vm0, %v150_v6  ;;  %p400_p2 = por %p399_p1, %p398_p0 }
  0x1a   : > { %347 = vmatmul.mubr.msk.bf16.vlgmr.msra.gmra.mxu0 %vm155_vm0, %v151_v8 }
  0x1b   : > { %p401_p3 = pnand %p400_p2, %p394_p13 }
  0xda   : > { %v348_v9 = vpop.f32.mrf.mxu0 }
  0xdc   : > { %v196_v10 = vpop.f32.mrf.mxu0 }
  0xde   : > { %v349_v11 = vpop.f32.mrf.mxu0 }
  0xdf   : > { %v338_v12 = vpack.c.bf16 %v349_v11, %v348_v9 }
  0xe0   : > { %v199_v13 = vpop.f32.mrf.mxu0 }
  0xe1   : > { %340 = vst [vmem:[%s137_s4 + $0x8] sm:$0xff] %v338_v12   ;;  %v333_v14 = vpack.c.bf16 %v199_v13, %v196_v10 }
  0xe3   : > { %334 = vst [vmem:[%s137_s4] sm:$0xff] %v333_v14  }
  0xe4   : > { %404 = shalt.err (!%p401_p3)
}
  0xe5   : > { %s405_s23 = scalar_lea.hbm %s536_s14, 256  ;;  %s409_s26 = scalar_lea.hbm %s580_s2, 512 }
  0xe6   : > { %p406_p4 = scmp.ne.s32.totalorder %s536_s14, %s405_s23  ;;  %p410_p9 = scmp.lt.s32.totalorder %s536_s14, %s580_s2 }
  0xe7   : > { %p411_p10 = scmp.lt.s32.totalorder %s409_s26, %s405_s23 }
  0xe8   : > { %p407_p7 = pnand %p406_p4, %p509_p5 }
  0xe9   : > { %p412_p11 = por %p411_p10, %p410_p9 }
  0xea   : > { %p408_p8 = pneg %p407_p7 }
  0xec   : > { %p413_p12 = pnand %p412_p11, %p408_p8 }
  0xee   : > { %416 = shalt.err (!%p413_p12)
}
  0xef   : > { %s454_s29 = smov 64   ;;  %s455_s30 = smov 4  }
  0xf0   : > { %350 = dma.vmem_to_hbm [thread:$0]  (%p509_p5), %s531_s5, 256, %s536_s14, %s538_s16, %s454_s29, %s454_s29, %s455_s30  }
  0xf1 PF: > { %p356_p13 = scmp.ge.s32.totalorder %s451_s12, 2  ;;  %s260_s3 = sand.u32 1, %s439_s9  }
  0xf2   : > { %s261_s4 = scalar_lea.sflag [#allocation3], %s260_s3 }
  0xf3   : > { %p353_p0 = pnand %p356_p13, %p513_p6 }
  0xf5   : > { %p354_p1 = pneg %p353_p0 }
  0xf7   : > { %434 = dma.done.wait (%p354_p1), %s261_s4, 256  }
  0xf8   : > { %436 = vsyncadd (%p354_p1), %s261_s4, 4294967040  ;;  %p12_p2 = scmp.ge.s32.totalorder %s496_s15, 4   ;;  %s583_s9 = smov %s443_s10 }
  0xf9   : > { %s584_s10 = smov %s447_s11  ;;  %s585_s11 = smov %s507_s18 }
  0xfa   : > { %s586_s12 = smov %s496_s15  ;;  %14 = sbr.rel (!%p12_p2) target bundleno = 3 (0x3), region = 63 }
  0xff   :  { %266 = vsyncpa [#allocation3], 1 }
 0x100   :  { %268 = vsyncpa [#allocation3 + $0x1], 1 }

</bundles_post_ra>
